<compile_context>
chip_gen: v7x
topology: tpu7x:2x2x1
jax: 0.10.0
libtpu: 0.0.40
codegen_flags: <defaults>
</compile_context>

<pallas_src>
import jax
import jax.numpy as jnp
from jax.experimental import pallas as pl
from jax.experimental.pallas import tpu as pltpu


def _relu_kernel(x_ref, o_ref):
    # Single VPU elementwise max over the whole VMEM-resident slab.
    o_ref[...] = jnp.maximum(x_ref[...], jnp.zeros((), x_ref.dtype))


@jax.jit
def relu_pallas(x_nchw: jax.Array) -> jax.Array:
    n, c, h, w = x_nchw.shape
    total = n * c * h * w

    # Lane-dense slab: last dim an exact multiple of 128 when possible.
    if total % 128 == 0:
        slab_shape = (total // 128, 128)       # (735, 128) for [1,120,28,28]
    else:
        slab_shape = (n * c, h * w)            # fallback (still correct)
    x2d = x_nchw.reshape(slab_shape)

    out2d = pl.pallas_call(
        _relu_kernel,
        out_shape=jax.ShapeDtypeStruct(x2d.shape, x2d.dtype),
        # No grid: whole array as one VMEM block — no pipeline bookkeeping.
        in_specs=[pl.BlockSpec(memory_space=pltpu.MemorySpace.VMEM)],
        out_specs=pl.BlockSpec(memory_space=pltpu.MemorySpace.VMEM),
        # Elementwise + inplace semantics: output aliases the input buffer.
        input_output_aliases={0: 0},
    )(x2d)

    return out2d.reshape(n, c, h, w)


if __name__ == "__main__":
    key = jax.random.PRNGKey(0)
    # Shape implied by the module's forward: [1, 120, 28, 28]
    x47 = jax.random.normal(key, (1, 120, 28, 28), dtype=jnp.float32)

    x48 = relu_pallas(x47)
    jax.block_until_ready(x48)

    # Correctness check against plain JAX reference.
    ref = jnp.maximum(x47, 0.0)
    assert x48.shape == x47.shape
    assert x48.dtype == x47.dtype
    assert bool(jnp.allclose(x48, ref)), "ReLU mismatch vs reference"

    print("KERNEL_OK")
</pallas_src>

<mosaic_0001>
module attributes {stable_mosaic.version = 11 : i64} {
  func.func @_relu_kernel(%arg0: memref<735x128xf32, #tpu.memory_space<vmem>>, %arg1: memref<735x128xf32, #tpu.memory_space<vmem>>) attributes {dimension_semantics = [], scalar_prefetch = 0 : i64, scratch_operands = 0 : i64, tpu.core_type = #tpu.core_type<tc>} {
    %c0 = arith.constant 0 : index
    %c0_0 = arith.constant 0 : index
    %0 = vector.load %arg0[%c0, %c0_0] : memref<735x128xf32, #tpu.memory_space<vmem>>, vector<735x128xf32>
    %cst = arith.constant 0.000000e+00 : f32
    %1 = vector.broadcast %cst : f32 to vector<735x128xf32>
    %2 = arith.maximumf %0, %1 : vector<735x128xf32>
    %c0_1 = arith.constant 0 : index
    %c0_2 = arith.constant 0 : index
    %3 = vector.load %arg1[%c0_1, %c0_2] : memref<735x128xf32, #tpu.memory_space<vmem>>, vector<735x128xf32>
    tpu.vector_store %arg1[%c0_1, %c0_2], %2 {strides = array<i32>} : memref<735x128xf32, #tpu.memory_space<vmem>>, vector<735x128xf32>,
    return
  }
}

</mosaic_0001>

<bundles_post_ra>
// kernel: relu_pallas.1
= control target key start
LH: loop header
LB: loop body
LE: loop exit
PB: predicated region body
PF: predicated region fallthrough
CT: control target
= control target key end

     0   :  { %s850_s0 = inlined_call_operand.vmem [shape: f32[735,128], index: 0, kind: input, shape index: {}, may-alias: {0,1}]   ;;  %s851_s1 = inlined_call_operand.vmem [shape: f32[735,128], index: 1, kind: output, shape index: {}, may-alias: {0,1}]  }
   0x1   :  { %v8_v0 = vld [vmem:[%s850_s0] sm:$0xff]  ;;  %v9_v1 = vld [vmem:[%s850_s0 + $0x8] sm:$0xff]  ;;  %v10_v2 = vld [vmem:[%s850_s0 + $0x10] sm:$0xff] }
   0x2   :  { %v100_v3 = vmax.f32 %v8_v0, 0.0  ;;  %v101_v4 = vmax.f32 %v9_v1, 0.0  ;;  %v102_v5 = vmax.f32 %v10_v2, 0.0  ;;  %v11_v6 = vld [vmem:[%s850_s0 + $0x18] sm:$0xff]  ;;  %v12_v7 = vld [vmem:[%s850_s0 + $0x20] sm:$0xff]  ;;  %v13_v8 = vld [vmem:[%s850_s0 + $0x28] sm:$0xff] }
   0x3   :  { %v103_v9 = vmax.f32 %v11_v6, 0.0  ;;  %v104_v10 = vmax.f32 %v12_v7, 0.0  ;;  %v105_v11 = vmax.f32 %v13_v8, 0.0  ;;  %v14_v12 = vld [vmem:[%s850_s0 + $0x30] sm:$0xff]  ;;  %v15_v13 = vld [vmem:[%s850_s0 + $0x38] sm:$0xff]  ;;  %v16_v14 = vld [vmem:[%s850_s0 + $0x40] sm:$0xff] }
   0x4   :  { %192 = vst [vmem:[%s851_s1] sm:$0xff] %v100_v3  ;;  %193 = vst [vmem:[%s851_s1 + $0x8] sm:$0xff] %v101_v4  ;;  %v106_v15 = vmax.f32 %v14_v12, 0.0  ;;  %v107_v16 = vmax.f32 %v15_v13, 0.0  ;;  %v108_v17 = vmax.f32 %v16_v14, 0.0 }
   0x5   :  { %194 = vst [vmem:[%s851_s1 + $0x10] sm:$0xff] %v102_v5 }
   0xc   :  { %v17_v18 = vld [vmem:[%s850_s0 + $0x48] sm:$0xff]  ;;  %v18_v19 = vld [vmem:[%s850_s0 + $0x50] sm:$0xff]  ;;  %v19_v20 = vld [vmem:[%s850_s0 + $0x58] sm:$0xff] }
   0xd   :  { %195 = vst [vmem:[%s851_s1 + $0x18] sm:$0xff] %v103_v9  ;;  %196 = vst [vmem:[%s851_s1 + $0x20] sm:$0xff] %v104_v10  ;;  %v109_v21 = vmax.f32 %v17_v18, 0.0  ;;  %v110_v22 = vmax.f32 %v18_v19, 0.0  ;;  %v111_v23 = vmax.f32 %v19_v20, 0.0 }
   0xe   :  { %197 = vst [vmem:[%s851_s1 + $0x28] sm:$0xff] %v105_v11 }
  0x15   :  { %v20_v24 = vld [vmem:[%s850_s0 + $0x60] sm:$0xff]  ;;  %v21_v25 = vld [vmem:[%s850_s0 + $0x68] sm:$0xff]  ;;  %v22_v26 = vld [vmem:[%s850_s0 + $0x70] sm:$0xff] }
  0x16   :  { %198 = vst [vmem:[%s851_s1 + $0x30] sm:$0xff] %v106_v15  ;;  %199 = vst [vmem:[%s851_s1 + $0x38] sm:$0xff] %v107_v16  ;;  %v112_v27 = vmax.f32 %v20_v24, 0.0  ;;  %v113_v28 = vmax.f32 %v21_v25, 0.0  ;;  %v114_v29 = vmax.f32 %v22_v26, 0.0 }
  0x17   :  { %200 = vst [vmem:[%s851_s1 + $0x40] sm:$0xff] %v108_v17 }
  0x1e   :  { %v23_v30 = vld [vmem:[%s850_s0 + $0x78] sm:$0xff]  ;;  %v24_v31 = vld [vmem:[%s850_s0 + $0x80] sm:$0xff]  ;;  %v25_v32 = vld [vmem:[%s850_s0 + $0x88] sm:$0xff] }
  0x1f   :  { %201 = vst [vmem:[%s851_s1 + $0x48] sm:$0xff] %v109_v21  ;;  %202 = vst [vmem:[%s851_s1 + $0x50] sm:$0xff] %v110_v22  ;;  %v115_v33 = vmax.f32 %v23_v30, 0.0  ;;  %v116_v34 = vmax.f32 %v24_v31, 0.0  ;;  %v117_v35 = vmax.f32 %v25_v32, 0.0 }
  0x20   :  { %203 = vst [vmem:[%s851_s1 + $0x58] sm:$0xff] %v111_v23 }
  0x27   :  { %v26_v36 = vld [vmem:[%s850_s0 + $0x90] sm:$0xff]  ;;  %v27_v37 = vld [vmem:[%s850_s0 + $0x98] sm:$0xff]  ;;  %v28_v38 = vld [vmem:[%s850_s0 + $0xa0] sm:$0xff] }
  0x28   :  { %204 = vst [vmem:[%s851_s1 + $0x60] sm:$0xff] %v112_v27  ;;  %205 = vst [vmem:[%s851_s1 + $0x68] sm:$0xff] %v113_v28  ;;  %v118_v39 = vmax.f32 %v26_v36, 0.0  ;;  %v119_v40 = vmax.f32 %v27_v37, 0.0  ;;  %v120_v41 = vmax.f32 %v28_v38, 0.0 }
  0x29   :  { %206 = vst [vmem:[%s851_s1 + $0x70] sm:$0xff] %v114_v29 }
  0x30   :  { %v29_v42 = vld [vmem:[%s850_s0 + $0xa8] sm:$0xff]  ;;  %v30_v43 = vld [vmem:[%s850_s0 + $0xb0] sm:$0xff]  ;;  %v31_v44 = vld [vmem:[%s850_s0 + $0xb8] sm:$0xff] }
  0x31   :  { %207 = vst [vmem:[%s851_s1 + $0x78] sm:$0xff] %v115_v33  ;;  %208 = vst [vmem:[%s851_s1 + $0x80] sm:$0xff] %v116_v34  ;;  %v121_v45 = vmax.f32 %v29_v42, 0.0  ;;  %v122_v46 = vmax.f32 %v30_v43, 0.0  ;;  %v123_v47 = vmax.f32 %v31_v44, 0.0 }
  0x32   :  { %209 = vst [vmem:[%s851_s1 + $0x88] sm:$0xff] %v117_v35 }
  0x39   :  { %v32_v48 = vld [vmem:[%s850_s0 + $0xc0] sm:$0xff]  ;;  %v33_v49 = vld [vmem:[%s850_s0 + $0xc8] sm:$0xff]  ;;  %v34_v50 = vld [vmem:[%s850_s0 + $0xd0] sm:$0xff] }
  0x3a   :  { %210 = vst [vmem:[%s851_s1 + $0x90] sm:$0xff] %v118_v39  ;;  %211 = vst [vmem:[%s851_s1 + $0x98] sm:$0xff] %v119_v40  ;;  %v124_v51 = vmax.f32 %v32_v48, 0.0  ;;  %v125_v52 = vmax.f32 %v33_v49, 0.0  ;;  %v126_v53 = vmax.f32 %v34_v50, 0.0 }
  0x3b   :  { %212 = vst [vmem:[%s851_s1 + $0xa0] sm:$0xff] %v120_v41 }
  0x42   :  { %v35_v54 = vld [vmem:[%s850_s0 + $0xd8] sm:$0xff]  ;;  %v36_v55 = vld [vmem:[%s850_s0 + $0xe0] sm:$0xff]  ;;  %v37_v56 = vld [vmem:[%s850_s0 + $0xe8] sm:$0xff] }
  0x43   :  { %213 = vst [vmem:[%s851_s1 + $0xa8] sm:$0xff] %v121_v45  ;;  %214 = vst [vmem:[%s851_s1 + $0xb0] sm:$0xff] %v122_v46  ;;  %v127_v57 = vmax.f32 %v35_v54, 0.0  ;;  %v128_v58 = vmax.f32 %v36_v55, 0.0  ;;  %v129_v59 = vmax.f32 %v37_v56, 0.0 }
  0x44   :  { %215 = vst [vmem:[%s851_s1 + $0xb8] sm:$0xff] %v123_v47 }
  0x4b   :  { %v38_v60 = vld [vmem:[%s850_s0 + $0xf0] sm:$0xff]  ;;  %v39_v61 = vld [vmem:[%s850_s0 + $0xf8] sm:$0xff]  ;;  %v40_v62 = vld [vmem:[%s850_s0 + $0x100] sm:$0xff] }
  0x4c   :  { %216 = vst [vmem:[%s851_s1 + $0xc0] sm:$0xff] %v124_v51  ;;  %217 = vst [vmem:[%s851_s1 + $0xc8] sm:$0xff] %v125_v52  ;;  %v130_v63 = vmax.f32 %v38_v60, 0.0  ;;  %v131_v0 = vmax.f32 %v39_v61, 0.0  ;;  %v132_v1 = vmax.f32 %v40_v62, 0.0 }
  0x4d   :  { %218 = vst [vmem:[%s851_s1 + $0xd0] sm:$0xff] %v126_v53 }
  0x54   :  { %v41_v2 = vld [vmem:[%s850_s0 + $0x108] sm:$0xff]  ;;  %v42_v3 = vld [vmem:[%s850_s0 + $0x110] sm:$0xff]  ;;  %v43_v4 = vld [vmem:[%s850_s0 + $0x118] sm:$0xff] }
  0x55   :  { %219 = vst [vmem:[%s851_s1 + $0xd8] sm:$0xff] %v127_v57  ;;  %220 = vst [vmem:[%s851_s1 + $0xe0] sm:$0xff] %v128_v58  ;;  %v133_v5 = vmax.f32 %v41_v2, 0.0  ;;  %v134_v6 = vmax.f32 %v42_v3, 0.0  ;;  %v135_v7 = vmax.f32 %v43_v4, 0.0 }
  0x56   :  { %221 = vst [vmem:[%s851_s1 + $0xe8] sm:$0xff] %v129_v59 }
  0x5d   :  { %v44_v8 = vld [vmem:[%s850_s0 + $0x120] sm:$0xff]  ;;  %v45_v9 = vld [vmem:[%s850_s0 + $0x128] sm:$0xff]  ;;  %v46_v10 = vld [vmem:[%s850_s0 + $0x130] sm:$0xff] }
  0x5e   :  { %222 = vst [vmem:[%s851_s1 + $0xf0] sm:$0xff] %v130_v63  ;;  %223 = vst [vmem:[%s851_s1 + $0xf8] sm:$0xff] %v131_v0  ;;  %v136_v11 = vmax.f32 %v44_v8, 0.0  ;;  %v137_v12 = vmax.f32 %v45_v9, 0.0  ;;  %v138_v13 = vmax.f32 %v46_v10, 0.0 }
  0x5f   :  { %224 = vst [vmem:[%s851_s1 + $0x100] sm:$0xff] %v132_v1 }
  0x66   :  { %v47_v14 = vld [vmem:[%s850_s0 + $0x138] sm:$0xff]  ;;  %v48_v15 = vld [vmem:[%s850_s0 + $0x140] sm:$0xff]  ;;  %v49_v16 = vld [vmem:[%s850_s0 + $0x148] sm:$0xff] }
  0x67   :  { %225 = vst [vmem:[%s851_s1 + $0x108] sm:$0xff] %v133_v5  ;;  %226 = vst [vmem:[%s851_s1 + $0x110] sm:$0xff] %v134_v6  ;;  %v139_v17 = vmax.f32 %v47_v14, 0.0  ;;  %v140_v18 = vmax.f32 %v48_v15, 0.0  ;;  %v141_v19 = vmax.f32 %v49_v16, 0.0 }
  0x68   :  { %227 = vst [vmem:[%s851_s1 + $0x118] sm:$0xff] %v135_v7 }
  0x6f   :  { %v50_v20 = vld [vmem:[%s850_s0 + $0x150] sm:$0xff]  ;;  %v51_v21 = vld [vmem:[%s850_s0 + $0x158] sm:$0xff]  ;;  %v52_v22 = vld [vmem:[%s850_s0 + $0x160] sm:$0xff] }
  0x70   :  { %228 = vst [vmem:[%s851_s1 + $0x120] sm:$0xff] %v136_v11  ;;  %229 = vst [vmem:[%s851_s1 + $0x128] sm:$0xff] %v137_v12  ;;  %v142_v23 = vmax.f32 %v50_v20, 0.0  ;;  %v143_v24 = vmax.f32 %v51_v21, 0.0  ;;  %v144_v25 = vmax.f32 %v52_v22, 0.0 }
  0x71   :  { %230 = vst [vmem:[%s851_s1 + $0x130] sm:$0xff] %v138_v13 }
  0x78   :  { %v53_v26 = vld [vmem:[%s850_s0 + $0x168] sm:$0xff]  ;;  %v54_v27 = vld [vmem:[%s850_s0 + $0x170] sm:$0xff]  ;;  %v55_v28 = vld [vmem:[%s850_s0 + $0x178] sm:$0xff] }
  0x79   :  { %231 = vst [vmem:[%s851_s1 + $0x138] sm:$0xff] %v139_v17  ;;  %232 = vst [vmem:[%s851_s1 + $0x140] sm:$0xff] %v140_v18  ;;  %v145_v29 = vmax.f32 %v53_v26, 0.0  ;;  %v146_v30 = vmax.f32 %v54_v27, 0.0  ;;  %v147_v31 = vmax.f32 %v55_v28, 0.0 }
  0x7a   :  { %233 = vst [vmem:[%s851_s1 + $0x148] sm:$0xff] %v141_v19 }
  0x81   :  { %v56_v32 = vld [vmem:[%s850_s0 + $0x180] sm:$0xff]  ;;  %v57_v33 = vld [vmem:[%s850_s0 + $0x188] sm:$0xff]  ;;  %v58_v34 = vld [vmem:[%s850_s0 + $0x190] sm:$0xff] }
  0x82   :  { %234 = vst [vmem:[%s851_s1 + $0x150] sm:$0xff] %v142_v23  ;;  %235 = vst [vmem:[%s851_s1 + $0x158] sm:$0xff] %v143_v24  ;;  %v148_v35 = vmax.f32 %v56_v32, 0.0  ;;  %v149_v36 = vmax.f32 %v57_v33, 0.0  ;;  %v150_v37 = vmax.f32 %v58_v34, 0.0 }
  0x83   :  { %236 = vst [vmem:[%s851_s1 + $0x160] sm:$0xff] %v144_v25 }
  0x8a   :  { %v59_v38 = vld [vmem:[%s850_s0 + $0x198] sm:$0xff]  ;;  %v60_v39 = vld [vmem:[%s850_s0 + $0x1a0] sm:$0xff]  ;;  %v61_v40 = vld [vmem:[%s850_s0 + $0x1a8] sm:$0xff] }
  0x8b   :  { %237 = vst [vmem:[%s851_s1 + $0x168] sm:$0xff] %v145_v29  ;;  %238 = vst [vmem:[%s851_s1 + $0x170] sm:$0xff] %v146_v30  ;;  %v151_v41 = vmax.f32 %v59_v38, 0.0  ;;  %v152_v42 = vmax.f32 %v60_v39, 0.0  ;;  %v153_v43 = vmax.f32 %v61_v40, 0.0 }
  0x8c   :  { %239 = vst [vmem:[%s851_s1 + $0x178] sm:$0xff] %v147_v31 }
  0x93   :  { %v62_v44 = vld [vmem:[%s850_s0 + $0x1b0] sm:$0xff]  ;;  %v63_v45 = vld [vmem:[%s850_s0 + $0x1b8] sm:$0xff]  ;;  %v64_v46 = vld [vmem:[%s850_s0 + $0x1c0] sm:$0xff] }
  0x94   :  { %240 = vst [vmem:[%s851_s1 + $0x180] sm:$0xff] %v148_v35  ;;  %241 = vst [vmem:[%s851_s1 + $0x188] sm:$0xff] %v149_v36  ;;  %v154_v47 = vmax.f32 %v62_v44, 0.0  ;;  %v155_v48 = vmax.f32 %v63_v45, 0.0  ;;  %v156_v49 = vmax.f32 %v64_v46, 0.0 }
  0x95   :  { %242 = vst [vmem:[%s851_s1 + $0x190] sm:$0xff] %v150_v37 }
  0x9c   :  { %v65_v50 = vld [vmem:[%s850_s0 + $0x1c8] sm:$0xff]  ;;  %v66_v51 = vld [vmem:[%s850_s0 + $0x1d0] sm:$0xff]  ;;  %v67_v52 = vld [vmem:[%s850_s0 + $0x1d8] sm:$0xff] }
  0x9d   :  { %243 = vst [vmem:[%s851_s1 + $0x198] sm:$0xff] %v151_v41  ;;  %244 = vst [vmem:[%s851_s1 + $0x1a0] sm:$0xff] %v152_v42  ;;  %v157_v53 = vmax.f32 %v65_v50, 0.0  ;;  %v158_v54 = vmax.f32 %v66_v51, 0.0  ;;  %v159_v55 = vmax.f32 %v67_v52, 0.0 }
  0x9e   :  { %245 = vst [vmem:[%s851_s1 + $0x1a8] sm:$0xff] %v153_v43 }
  0xa5   :  { %v68_v56 = vld [vmem:[%s850_s0 + $0x1e0] sm:$0xff]  ;;  %v69_v57 = vld [vmem:[%s850_s0 + $0x1e8] sm:$0xff]  ;;  %v70_v58 = vld [vmem:[%s850_s0 + $0x1f0] sm:$0xff] }
  0xa6   :  { %246 = vst [vmem:[%s851_s1 + $0x1b0] sm:$0xff] %v154_v47  ;;  %247 = vst [vmem:[%s851_s1 + $0x1b8] sm:$0xff] %v155_v48  ;;  %v160_v59 = vmax.f32 %v68_v56, 0.0  ;;  %v161_v60 = vmax.f32 %v69_v57, 0.0  ;;  %v162_v61 = vmax.f32 %v70_v58, 0.0 }
  0xa7   :  { %248 = vst [vmem:[%s851_s1 + $0x1c0] sm:$0xff] %v156_v49 }
  0xae   :  { %v71_v62 = vld [vmem:[%s850_s0 + $0x1f8] sm:$0xff]  ;;  %v72_v63 = vld [vmem:[%s850_s0 + $0x200] sm:$0xff]  ;;  %v73_v0 = vld [vmem:[%s850_s0 + $0x208] sm:$0xff] }
  0xaf   :  { %249 = vst [vmem:[%s851_s1 + $0x1c8] sm:$0xff] %v157_v53  ;;  %250 = vst [vmem:[%s851_s1 + $0x1d0] sm:$0xff] %v158_v54  ;;  %v163_v1 = vmax.f32 %v71_v62, 0.0  ;;  %v164_v2 = vmax.f32 %v72_v63, 0.0  ;;  %v165_v3 = vmax.f32 %v73_v0, 0.0 }
  0xb0   :  { %251 = vst [vmem:[%s851_s1 + $0x1d8] sm:$0xff] %v159_v55 }
  0xb7   :  { %v74_v4 = vld [vmem:[%s850_s0 + $0x210] sm:$0xff]  ;;  %v75_v5 = vld [vmem:[%s850_s0 + $0x218] sm:$0xff]  ;;  %v76_v6 = vld [vmem:[%s850_s0 + $0x220] sm:$0xff] }
  0xb8   :  { %252 = vst [vmem:[%s851_s1 + $0x1e0] sm:$0xff] %v160_v59  ;;  %253 = vst [vmem:[%s851_s1 + $0x1e8] sm:$0xff] %v161_v60  ;;  %v166_v7 = vmax.f32 %v74_v4, 0.0  ;;  %v167_v8 = vmax.f32 %v75_v5, 0.0  ;;  %v168_v9 = vmax.f32 %v76_v6, 0.0 }
  0xb9   :  { %254 = vst [vmem:[%s851_s1 + $0x1f0] sm:$0xff] %v162_v61 }
  0xc0   :  { %v77_v10 = vld [vmem:[%s850_s0 + $0x228] sm:$0xff]  ;;  %v78_v11 = vld [vmem:[%s850_s0 + $0x230] sm:$0xff]  ;;  %v79_v12 = vld [vmem:[%s850_s0 + $0x238] sm:$0xff] }
  0xc1   :  { %255 = vst [vmem:[%s851_s1 + $0x1f8] sm:$0xff] %v163_v1  ;;  %256 = vst [vmem:[%s851_s1 + $0x200] sm:$0xff] %v164_v2  ;;  %v169_v13 = vmax.f32 %v77_v10, 0.0  ;;  %v170_v14 = vmax.f32 %v78_v11, 0.0  ;;  %v171_v15 = vmax.f32 %v79_v12, 0.0 }
  0xc2   :  { %257 = vst [vmem:[%s851_s1 + $0x208] sm:$0xff] %v165_v3 }
  0xc9   :  { %v80_v16 = vld [vmem:[%s850_s0 + $0x240] sm:$0xff]  ;;  %v81_v17 = vld [vmem:[%s850_s0 + $0x248] sm:$0xff]  ;;  %v82_v18 = vld [vmem:[%s850_s0 + $0x250] sm:$0xff] }
  0xca   :  { %258 = vst [vmem:[%s851_s1 + $0x210] sm:$0xff] %v166_v7  ;;  %259 = vst [vmem:[%s851_s1 + $0x218] sm:$0xff] %v167_v8  ;;  %v172_v19 = vmax.f32 %v80_v16, 0.0  ;;  %v173_v20 = vmax.f32 %v81_v17, 0.0  ;;  %v174_v21 = vmax.f32 %v82_v18, 0.0 }
  0xcb   :  { %260 = vst [vmem:[%s851_s1 + $0x220] sm:$0xff] %v168_v9 }
  0xd2   :  { %v83_v22 = vld [vmem:[%s850_s0 + $0x258] sm:$0xff]  ;;  %v84_v23 = vld [vmem:[%s850_s0 + $0x260] sm:$0xff]  ;;  %v85_v24 = vld [vmem:[%s850_s0 + $0x268] sm:$0xff] }
  0xd3   :  { %261 = vst [vmem:[%s851_s1 + $0x228] sm:$0xff] %v169_v13  ;;  %262 = vst [vmem:[%s851_s1 + $0x230] sm:$0xff] %v170_v14  ;;  %v175_v25 = vmax.f32 %v83_v22, 0.0  ;;  %v176_v26 = vmax.f32 %v84_v23, 0.0  ;;  %v177_v27 = vmax.f32 %v85_v24, 0.0 }
  0xd4   :  { %263 = vst [vmem:[%s851_s1 + $0x238] sm:$0xff] %v171_v15 }
  0xdb   :  { %v86_v28 = vld [vmem:[%s850_s0 + $0x270] sm:$0xff]  ;;  %v87_v29 = vld [vmem:[%s850_s0 + $0x278] sm:$0xff]  ;;  %v88_v30 = vld [vmem:[%s850_s0 + $0x280] sm:$0xff] }
  0xdc   :  { %264 = vst [vmem:[%s851_s1 + $0x240] sm:$0xff] %v172_v19  ;;  %265 = vst [vmem:[%s851_s1 + $0x248] sm:$0xff] %v173_v20  ;;  %v178_v31 = vmax.f32 %v86_v28, 0.0  ;;  %v179_v32 = vmax.f32 %v87_v29, 0.0  ;;  %v180_v33 = vmax.f32 %v88_v30, 0.0 }
  0xdd   :  { %266 = vst [vmem:[%s851_s1 + $0x250] sm:$0xff] %v174_v21 }
  0xe4   :  { %v89_v34 = vld [vmem:[%s850_s0 + $0x288] sm:$0xff]  ;;  %v90_v35 = vld [vmem:[%s850_s0 + $0x290] sm:$0xff]  ;;  %v91_v36 = vld [vmem:[%s850_s0 + $0x298] sm:$0xff] }
  0xe5   :  { %267 = vst [vmem:[%s851_s1 + $0x258] sm:$0xff] %v175_v25  ;;  %268 = vst [vmem:[%s851_s1 + $0x260] sm:$0xff] %v176_v26  ;;  %v181_v37 = vmax.f32 %v89_v34, 0.0  ;;  %v182_v38 = vmax.f32 %v90_v35, 0.0  ;;  %v183_v39 = vmax.f32 %v91_v36, 0.0 }
  0xe6   :  { %269 = vst [vmem:[%s851_s1 + $0x268] sm:$0xff] %v177_v27 }
  0xed   :  { %v92_v40 = vld [vmem:[%s850_s0 + $0x2a0] sm:$0xff]  ;;  %v93_v41 = vld [vmem:[%s850_s0 + $0x2a8] sm:$0xff]  ;;  %v94_v42 = vld [vmem:[%s850_s0 + $0x2b0] sm:$0xff] }
  0xee   :  { %270 = vst [vmem:[%s851_s1 + $0x270] sm:$0xff] %v178_v31  ;;  %271 = vst [vmem:[%s851_s1 + $0x278] sm:$0xff] %v179_v32  ;;  %v184_v43 = vmax.f32 %v92_v40, 0.0  ;;  %v185_v44 = vmax.f32 %v93_v41, 0.0  ;;  %v186_v45 = vmax.f32 %v94_v42, 0.0 }
  0xef   :  { %272 = vst [vmem:[%s851_s1 + $0x280] sm:$0xff] %v180_v33 }
  0xf6   :  { %v95_v46 = vld [vmem:[%s850_s0 + $0x2b8] sm:$0xff]  ;;  %v96_v47 = vld [vmem:[%s850_s0 + $0x2c0] sm:$0xff]  ;;  %v97_v48 = vld [vmem:[%s850_s0 + $0x2c8] sm:$0xff] }
  0xf7   :  { %273 = vst [vmem:[%s851_s1 + $0x288] sm:$0xff] %v181_v37  ;;  %274 = vst [vmem:[%s851_s1 + $0x290] sm:$0xff] %v182_v38  ;;  %v187_v49 = vmax.f32 %v95_v46, 0.0  ;;  %v188_v50 = vmax.f32 %v96_v47, 0.0  ;;  %v189_v51 = vmax.f32 %v97_v48, 0.0 }
  0xf8   :  { %275 = vst [vmem:[%s851_s1 + $0x298] sm:$0xff] %v183_v39 }
  0xff   :  { %v98_v52 = vld [vmem:[%s850_s0 + $0x2d0] sm:$0xff]  ;;  %v99_v53 = vld [vmem:[%s850_s0 + $0x2d8] sm:$0x7f] }
 0x100   :  { %276 = vst [vmem:[%s851_s1 + $0x2a0] sm:$0xff] %v184_v43  ;;  %277 = vst [vmem:[%s851_s1 + $0x2a8] sm:$0xff] %v185_v44  ;;  %v190_v54 = vmax.f32 %v98_v52, 0.0  ;;  %v191_v55 = vmax.f32 %v99_v53, 0.0 }
 0x101   :  { %278 = vst [vmem:[%s851_s1 + $0x2b0] sm:$0xff] %v186_v45  ;;  %279 = vst [vmem:[%s851_s1 + $0x2b8] sm:$0xff] %v187_v49 }
 0x102   :  { %280 = vst [vmem:[%s851_s1 + $0x2c0] sm:$0xff] %v188_v50  ;;  %281 = vst [vmem:[%s851_s1 + $0x2c8] sm:$0xff] %v189_v51 }
 0x103   :  { %282 = vst [vmem:[%s851_s1 + $0x2d0] sm:$0xff] %v190_v54  ;;  %283 = vst [vmem:[%s851_s1 + $0x2d8] sm:$0x7f] %v191_v55 }

</bundles_post_ra>
